<compile_context>
chip_gen: v5e
topology: v5e:2x2
jax: 0.10.0
libtpu: 0.0.40
codegen_flags: <defaults>
</compile_context>

<pallas_src>
import jax
import jax.numpy as jnp
import numpy as np
from jax.experimental import pallas as pl
from jax.experimental.pallas import tpu as pltpu

_HALF_LOG_2PI = 0.9189385332046727  # 0.5 * log(2*pi)  (Normal(0,1) log-prob constant)


# ----------------------------------------------------------------------------
# Kernel
# ----------------------------------------------------------------------------
def realnvp2d_kernel(scale_ref, shift_ref,                     # scalar prefetch (SMEM)
                     x_ref, w1_ref, b1_ref, w2_ref, b2_ref, w3_ref, b3_ref,
                     out_ref):
    """One batch tile.  x_ref: (2, TN).  out_ref: (4, TN) = [z1; z2; det; per_sample]."""
    num_layers = w1_ref.shape[0]

    x = x_ref[...]                       # (2, TN) float32  (== inp.float())
    x1 = x[0:1, :]                       # torch.chunk(inp, 2, dim=1)
    x2 = x[1:2, :]
    det = jnp.zeros_like(x1)             # (1, TN)

    for l in range(num_layers):          # layers alternate inplace = 0, 1, 0, 1, ...
        inplace = l % 2
        cond = x1 if inplace == 0 else x2

        # Fused g_scale/g_shift MLP.  Layer 1 has contraction K=1 -> broadcast
        # multiply on the VPU instead of a padded MXU dot.
        h1 = jnp.maximum(w1_ref[l] * cond + b1_ref[l], 0.0)                   # (128, TN)
        h2 = jnp.dot(w2_ref[l], h1, preferred_element_type=jnp.float32)       # (64, TN)
        h2 = jnp.maximum(h2 + b2_ref[l], 0.0)
        g = jnp.dot(w3_ref[l], h2, preferred_element_type=jnp.float32)        # (2, TN)
        g = g + b3_ref[l]
        g_scale = g[0:1, :]
        g_shift = g[1:2, :]

        log_scale = scale_ref[l] * jnp.tanh(g_scale) + shift_ref[l]
        if inplace == 0:
            x2 = jnp.exp(log_scale) * x2 + g_shift
        else:
            x1 = jnp.exp(log_scale) * x1 + g_shift
        det = det + log_scale

    # per_sample = det + Normal(0,1).log_prob(z).sum(features)
    logprob = -0.5 * (x1 * x1 + x2 * x2) - 2.0 * _HALF_LOG_2PI                # (1, TN)
    per_sample = det + logprob

    # Single lane-dense output slab: rows 0-1 = z, row 2 = det, row 3 = per-sample loss.
    out_ref[...] = jnp.concatenate([x1, x2, det, per_sample], axis=0)


# ----------------------------------------------------------------------------
# Host-side weight packing (done once, outside the kernel)
# ----------------------------------------------------------------------------
def _pack_params(params):
    """Fuse the g_scale / g_shift sub-nets of every coupling layer."""
    scale, scale_shift, w1s, b1s, w2s, b2s, w3s, b3s = params
    L = w1s.shape[0]
    H1 = w1s.shape[2]          # 64
    H2 = w2s.shape[2]          # 32
    f32 = jnp.float32

    # layer 1: stack  -> (L, 2*H1, 1)
    w1f = jnp.concatenate([w1s[:, 0], w1s[:, 1]], axis=1).astype(f32)   # (L, 128, 1)
    b1f = jnp.concatenate([b1s[:, 0], b1s[:, 1]], axis=1).astype(f32)   # (L, 128, 1)

    # layer 2: block-diagonal -> (L, 2*H2, 2*H1)
    zero2 = jnp.zeros((L, H2, H1), f32)
    top = jnp.concatenate([w2s[:, 0].astype(f32), zero2], axis=2)       # (L, 32, 128)
    bot = jnp.concatenate([zero2, w2s[:, 1].astype(f32)], axis=2)       # (L, 32, 128)
    w2f = jnp.concatenate([top, bot], axis=1)                           # (L, 64, 128)
    b2f = jnp.concatenate([b2s[:, 0], b2s[:, 1]], axis=1).astype(f32)   # (L, 64, 1)

    # layer 3: block -> (L, 2, 2*H2); row 0 -> g_scale, row 1 -> g_shift
    zero3 = jnp.zeros((L, 1, H2), f32)
    r0 = jnp.concatenate([w3s[:, 0].astype(f32), zero3], axis=2)        # (L, 1, 64)
    r1 = jnp.concatenate([zero3, w3s[:, 1].astype(f32)], axis=2)        # (L, 1, 64)
    w3f = jnp.concatenate([r0, r1], axis=1)                             # (L, 2, 64)
    b3f = jnp.concatenate([b3s[:, 0], b3s[:, 1]], axis=1).astype(f32)   # (L, 2, 1)

    return (scale.astype(f32), scale_shift.astype(f32),
            w1f, b1f, w2f, b2f, w3f, b3f)


# ----------------------------------------------------------------------------
# Wrapper
# ----------------------------------------------------------------------------
def realnvp2d_forward(x, params, tile_n=4096):
    """x: (N, 2).  Returns (z (N,2), det (N,1), loss scalar), matching the torch module."""
    assert tile_n % 128 == 0, "tile_n must be a multiple of the 128-wide lane axis"
    scale, scale_shift, w1f, b1f, w2f, b2f, w3f, b3f = _pack_params(params)

    N = x.shape[0]
    n128 = ((N + 127) // 128) * 128
    tile = min(tile_n, n128)                 # clamp tile to small batches
    n_pad = pl.cdiv(N, tile) * tile          # pad batch to a tile multiple
    x_t = jnp.pad(x.astype(jnp.float32).T, ((0, 0), (0, n_pad - N)))     # (2, n_pad)

    def _full(shape):
        nd = len(shape)
        return pl.BlockSpec(shape, lambda i, s, t, _nd=nd: (0,) * _nd)

    out = pl.pallas_call(
        realnvp2d_kernel,
        out_shape=jax.ShapeDtypeStruct((4, n_pad), jnp.float32),
        grid_spec=pltpu.PrefetchScalarGridSpec(
            num_scalar_prefetch=2,                       # scale, scale_shift -> SMEM
            grid=(n_pad // tile,),
            in_specs=[
                pl.BlockSpec((2, tile), lambda i, s, t: (0, i)),          # x (features, batch)
                _full(w1f.shape), _full(b1f.shape),
                _full(w2f.shape), _full(b2f.shape),
                _full(w3f.shape), _full(b3f.shape),
            ],
            out_specs=pl.BlockSpec((4, tile), lambda i, s, t: (0, i)),    # [z; det; per_sample]
        ),
        compiler_params=pltpu.CompilerParams(
            dimension_semantics=("parallel",)),          # no cross-tile state -> megacore OK
    )(scale, scale_shift, x_t, w1f, b1f, w2f, b2f, w3f, b3f)

    z = out[0:2, :N].T                                   # (N, 2)
    det = out[2:3, :N].T                                 # (N, 1)
    per_sample = out[3, :N]                              # (N,)
    loss = -jnp.mean(per_sample) / 2.0                   # reduction done in the wrapper
    return z, det, loss


# ----------------------------------------------------------------------------
# Parameters / reference
# ----------------------------------------------------------------------------
def init_params(key, layers=2):
    """Synthetic parameters with the module's shapes (torch Linear convention: (out, in)).

    Stacked as (layer, net) where net 0 = g_scale, net 1 = g_shift; biases stored as (out, 1).
    """
    ks = jax.random.split(key, 8)
    L = layers

    def rnd(k, shape, std):
        return (std * jax.random.normal(k, shape)).astype(jnp.float32)

    scale = rnd(ks[0], (L,), 0.02)             # self.scale
    scale_shift = rnd(ks[1], (L,), 0.02)       # self.scale_shift
    w1s = rnd(ks[2], (L, 2, 64, 1), 0.5)       # Linear(1, 64)
    b1s = rnd(ks[3], (L, 2, 64, 1), 0.1)
    w2s = rnd(ks[4], (L, 2, 32, 64), 0.1)      # Linear(64, 32)
    b2s = rnd(ks[5], (L, 2, 32, 1), 0.1)
    w3s = rnd(ks[6], (L, 2, 1, 32), 0.1)       # Linear(32, 1)
    b3s = rnd(ks[7], (L, 2, 1, 1), 0.1)
    return (scale, scale_shift, w1s, b1s, w2s, b2s, w3s, b3s)


def reference_forward(x, params):
    """float64 numpy replica of RealNVP2D.forward (uses the UNFUSED per-layer weights)."""
    scale, scale_shift, w1s, b1s, w2s, b2s, w3s, b3s = (
        np.asarray(p, np.float64) for p in params)
    x = np.asarray(x, np.float64)
    x1, x2 = x[:, 0:1], x[:, 1:2]
    det = np.zeros_like(x1)
    L = w1s.shape[0]

    def mlp(l, n, inp):
        h = inp @ w1s[l, n].T + b1s[l, n][:, 0]
        h = np.maximum(h, 0.0)
        h = h @ w2s[l, n].T + b2s[l, n][:, 0]
        h = np.maximum(h, 0.0)
        return h @ w3s[l, n].T + b3s[l, n][:, 0]

    for l in range(L):
        inplace = l % 2
        cond = x1 if inplace == 0 else x2
        log_scale = scale[l] * np.tanh(mlp(l, 0, cond)) + scale_shift[l]
        shift = mlp(l, 1, cond)
        if inplace == 0:
            x2 = np.exp(log_scale) * x2 + shift
        else:
            x1 = np.exp(log_scale) * x1 + shift
        det = det + log_scale

    z = np.concatenate([x1, x2], axis=1)
    logprob = np.sum(-0.5 * z * z - _HALF_LOG_2PI, axis=1)
    loss = -np.mean(det[:, 0] + logprob) / 2.0
    return z, det, loss


if __name__ == "__main__":
    key = jax.random.PRNGKey(0)
    pkey, xkey = jax.random.split(key)
    params = init_params(pkey, layers=2)

    # (batch, tile_n): first case exercises padding/clamping (200 -> pad 256, one tile),
    # second exercises a multi-tile "parallel" grid (1024 lanes / 256-lane tiles = 4 steps).
    for n, tile_n in [(200, 4096), (1024, 256)]:
        x = jax.random.normal(jax.random.fold_in(xkey, n), (n, 2), dtype=jnp.float32)

        z, det, loss = jax.block_until_ready(realnvp2d_forward(x, params, tile_n=tile_n))

        z_ref, det_ref, loss_ref = reference_forward(np.asarray(x), params)
        np.testing.assert_allclose(np.asarray(z), z_ref, rtol=1e-4, atol=1e-5)
        np.testing.assert_allclose(np.asarray(det), det_ref, rtol=1e-4, atol=1e-5)
        np.testing.assert_allclose(float(loss), loss_ref, rtol=1e-4, atol=1e-5)

    print("KERNEL_OK")
</pallas_src>

<mosaic_0001>
module attributes {stable_mosaic.version = 11 : i64} {
  func.func @realnvp2d_kernel(%arg0: i32, %arg1: memref<2xf32, #tpu.memory_space<smem>>, %arg2: memref<2xf32, #tpu.memory_space<smem>>, %arg3: memref<2x256xf32, #tpu.memory_space<vmem>>, %arg4: memref<2x128x1xf32, #tpu.memory_space<vmem>>, %arg5: memref<2x128x1xf32, #tpu.memory_space<vmem>>, %arg6: memref<2x64x128xf32, #tpu.memory_space<vmem>>, %arg7: memref<2x64x1xf32, #tpu.memory_space<vmem>>, %arg8: memref<2x2x64xf32, #tpu.memory_space<vmem>>, %arg9: memref<2x2x1xf32, #tpu.memory_space<vmem>>, %arg10: memref<4x256xf32, #tpu.memory_space<vmem>>) attributes {dimension_semantics = [#tpu.dimension_semantics<parallel>], iteration_bounds = array<i64: 1>, scalar_prefetch = 2 : i64, scratch_operands = 0 : i64, tpu.core_type = #tpu.core_type<tc>, window_params = [{transform_indices = @transform_0, window_bounds = array<i64: 2, 256>}, {pipeline_mode = #tpu.pipeline_mode<synchronous>, transform_indices = @transform_1, window_bounds = array<i64: 2, 128, 1>}, {pipeline_mode = #tpu.pipeline_mode<synchronous>, transform_indices = @transform_2, window_bounds = array<i64: 2, 128, 1>}, {pipeline_mode = #tpu.pipeline_mode<synchronous>, transform_indices = @transform_3, window_bounds = array<i64: 2, 64, 128>}, {pipeline_mode = #tpu.pipeline_mode<synchronous>, transform_indices = @transform_4, window_bounds = array<i64: 2, 64, 1>}, {pipeline_mode = #tpu.pipeline_mode<synchronous>, transform_indices = @transform_5, window_bounds = array<i64: 2, 2, 64>}, {pipeline_mode = #tpu.pipeline_mode<synchronous>, transform_indices = @transform_6, window_bounds = array<i64: 2, 2, 1>}, {transform_indices = @transform_7, window_bounds = array<i64: 4, 256>}]} {
    %c0 = arith.constant 0 : index
    %c0_0 = arith.constant 0 : index
    %0 = vector.load %arg3[%c0, %c0_0] : memref<2x256xf32, #tpu.memory_space<vmem>>, vector<2x256xf32>
    %1 = vector.extract_strided_slice %0 {offsets = [0, 0], sizes = [1, 256], strides = [1, 1]} : vector<2x256xf32> to vector<1x256xf32>
    %2 = vector.extract_strided_slice %0 {offsets = [1, 0], sizes = [1, 256], strides = [1, 1]} : vector<2x256xf32> to vector<1x256xf32>
    %cst = arith.constant 0.000000e+00 : f32
    %3 = vector.broadcast %cst : f32 to vector<1x256xf32>
    %c0_1 = arith.constant 0 : index
    %c0_2 = arith.constant 0 : index
    %c0_3 = arith.constant 0 : index
    %4 = vector.load %arg4[%c0_1, %c0_2, %c0_3] : memref<2x128x1xf32, #tpu.memory_space<vmem>>, vector<1x128x1xf32>
    %5 = vector.shape_cast %4 : vector<1x128x1xf32> to vector<128x1xf32>
    %6 = vector.broadcast %5 : vector<128x1xf32> to vector<128x256xf32>
    %7 = vector.broadcast %1 : vector<1x256xf32> to vector<128x256xf32>
    %8 = arith.mulf %6, %7 : vector<128x256xf32>
    %c0_4 = arith.constant 0 : index
    %c0_5 = arith.constant 0 : index
    %c0_6 = arith.constant 0 : index
    %9 = vector.load %arg5[%c0_4, %c0_5, %c0_6] : memref<2x128x1xf32, #tpu.memory_space<vmem>>, vector<1x128x1xf32>
    %10 = vector.shape_cast %9 : vector<1x128x1xf32> to vector<128x1xf32>
    %11 = vector.broadcast %10 : vector<128x1xf32> to vector<128x256xf32>
    %12 = arith.addf %8, %11 : vector<128x256xf32>
    %cst_7 = arith.constant 0.000000e+00 : f32
    %13 = vector.broadcast %cst_7 : f32 to vector<128x256xf32>
    %14 = arith.maximumf %12, %13 : vector<128x256xf32>
    %c0_8 = arith.constant 0 : index
    %c0_9 = arith.constant 0 : index
    %c0_10 = arith.constant 0 : index
    %15 = vector.load %arg6[%c0_8, %c0_9, %c0_10] : memref<2x64x128xf32, #tpu.memory_space<vmem>>, vector<1x64x128xf32>
    %16 = vector.shape_cast %15 : vector<1x64x128xf32> to vector<64x128xf32>
    %cst_11 = arith.constant dense<0.000000e+00> : vector<64x256xf32>
    %17 = tpu.matmul %16, %14, %cst_11 {dimension_numbers = #tpu.dot_dimension_numbers<[1], [0], [0], [1], [0, 0, 1, 1], [], []>} : vector<64x128xf32>, vector<128x256xf32>, vector<64x256xf32> -> vector<64x256xf32>
    %c0_12 = arith.constant 0 : index
    %c0_13 = arith.constant 0 : index
    %c0_14 = arith.constant 0 : index
    %18 = vector.load %arg7[%c0_12, %c0_13, %c0_14] : memref<2x64x1xf32, #tpu.memory_space<vmem>>, vector<1x64x1xf32>
    %19 = vector.shape_cast %18 : vector<1x64x1xf32> to vector<64x1xf32>
    %20 = vector.broadcast %19 : vector<64x1xf32> to vector<64x256xf32>
    %21 = arith.addf %17, %20 : vector<64x256xf32>
    %cst_15 = arith.constant 0.000000e+00 : f32
    %22 = vector.broadcast %cst_15 : f32 to vector<64x256xf32>
    %23 = arith.maximumf %21, %22 : vector<64x256xf32>
    %c0_16 = arith.constant 0 : index
    %c0_17 = arith.constant 0 : index
    %c0_18 = arith.constant 0 : index
    %24 = vector.load %arg8[%c0_16, %c0_17, %c0_18] : memref<2x2x64xf32, #tpu.memory_space<vmem>>, vector<1x2x64xf32>
    %25 = vector.shape_cast %24 : vector<1x2x64xf32> to vector<2x64xf32>
    %cst_19 = arith.constant dense<0.000000e+00> : vector<2x256xf32>
    %26 = tpu.matmul %25, %23, %cst_19 {dimension_numbers = #tpu.dot_dimension_numbers<[1], [0], [0], [1], [0, 0, 1, 1], [], []>} : vector<2x64xf32>, vector<64x256xf32>, vector<2x256xf32> -> vector<2x256xf32>
    %c0_20 = arith.constant 0 : index
    %c0_21 = arith.constant 0 : index
    %c0_22 = arith.constant 0 : index
    %27 = vector.load %arg9[%c0_20, %c0_21, %c0_22] : memref<2x2x1xf32, #tpu.memory_space<vmem>>, vector<1x2x1xf32>
    %28 = vector.shape_cast %27 : vector<1x2x1xf32> to vector<2x1xf32>
    %29 = vector.broadcast %28 : vector<2x1xf32> to vector<2x256xf32>
    %30 = arith.addf %26, %29 : vector<2x256xf32>
    %31 = vector.extract_strided_slice %30 {offsets = [0, 0], sizes = [1, 256], strides = [1, 1]} : vector<2x256xf32> to vector<1x256xf32>
    %32 = vector.extract_strided_slice %30 {offsets = [1, 0], sizes = [1, 256], strides = [1, 1]} : vector<2x256xf32> to vector<1x256xf32>
    %c0_23 = arith.constant 0 : index
    %33 = memref.load %arg1[%c0_23] : memref<2xf32, #tpu.memory_space<smem>>
    %34 = math.tanh %31 : vector<1x256xf32>
    %35 = vector.broadcast %33 : f32 to vector<1x256xf32>
    %36 = arith.mulf %35, %34 : vector<1x256xf32>
    %c0_24 = arith.constant 0 : index
    %37 = memref.load %arg2[%c0_24] : memref<2xf32, #tpu.memory_space<smem>>
    %38 = vector.broadcast %37 : f32 to vector<1x256xf32>
    %39 = arith.addf %36, %38 : vector<1x256xf32>
    %40 = math.exp %39 : vector<1x256xf32>
    %41 = arith.mulf %40, %2 : vector<1x256xf32>
    %42 = arith.addf %41, %32 : vector<1x256xf32>
    %43 = arith.addf %3, %39 : vector<1x256xf32>
    %c1 = arith.constant 1 : index
    %c0_25 = arith.constant 0 : index
    %c0_26 = arith.constant 0 : index
    %44 = vector.load %arg4[%c1, %c0_25, %c0_26] : memref<2x128x1xf32, #tpu.memory_space<vmem>>, vector<1x128x1xf32>
    %45 = vector.shape_cast %44 : vector<1x128x1xf32> to vector<128x1xf32>
    %46 = vector.broadcast %45 : vector<128x1xf32> to vector<128x256xf32>
    %47 = vector.broadcast %42 : vector<1x256xf32> to vector<128x256xf32>
    %48 = arith.mulf %46, %47 : vector<128x256xf32>
    %c1_27 = arith.constant 1 : index
    %c0_28 = arith.constant 0 : index
    %c0_29 = arith.constant 0 : index
    %49 = vector.load %arg5[%c1_27, %c0_28, %c0_29] : memref<2x128x1xf32, #tpu.memory_space<vmem>>, vector<1x128x1xf32>
    %50 = vector.shape_cast %49 : vector<1x128x1xf32> to vector<128x1xf32>
    %51 = vector.broadcast %50 : vector<128x1xf32> to vector<128x256xf32>
    %52 = arith.addf %48, %51 : vector<128x256xf32>
    %cst_30 = arith.constant 0.000000e+00 : f32
    %53 = vector.broadcast %cst_30 : f32 to vector<128x256xf32>
    %54 = arith.maximumf %52, %53 : vector<128x256xf32>
    %c1_31 = arith.constant 1 : index
    %c0_32 = arith.constant 0 : index
    %c0_33 = arith.constant 0 : index
    %55 = vector.load %arg6[%c1_31, %c0_32, %c0_33] : memref<2x64x128xf32, #tpu.memory_space<vmem>>, vector<1x64x128xf32>
    %56 = vector.shape_cast %55 : vector<1x64x128xf32> to vector<64x128xf32>
    %cst_34 = arith.constant dense<0.000000e+00> : vector<64x256xf32>
    %57 = tpu.matmul %56, %54, %cst_34 {dimension_numbers = #tpu.dot_dimension_numbers<[1], [0], [0], [1], [0, 0, 1, 1], [], []>} : vector<64x128xf32>, vector<128x256xf32>, vector<64x256xf32> -> vector<64x256xf32>
    %c1_35 = arith.constant 1 : index
    %c0_36 = arith.constant 0 : index
    %c0_37 = arith.constant 0 : index
    %58 = vector.load %arg7[%c1_35, %c0_36, %c0_37] : memref<2x64x1xf32, #tpu.memory_space<vmem>>, vector<1x64x1xf32>
    %59 = vector.shape_cast %58 : vector<1x64x1xf32> to vector<64x1xf32>
    %60 = vector.broadcast %59 : vector<64x1xf32> to vector<64x256xf32>
    %61 = arith.addf %57, %60 : vector<64x256xf32>
    %cst_38 = arith.constant 0.000000e+00 : f32
    %62 = vector.broadcast %cst_38 : f32 to vector<64x256xf32>
    %63 = arith.maximumf %61, %62 : vector<64x256xf32>
    %c1_39 = arith.constant 1 : index
    %c0_40 = arith.constant 0 : index
    %c0_41 = arith.constant 0 : index
    %64 = vector.load %arg8[%c1_39, %c0_40, %c0_41] : memref<2x2x64xf32, #tpu.memory_space<vmem>>, vector<1x2x64xf32>
    %65 = vector.shape_cast %64 : vector<1x2x64xf32> to vector<2x64xf32>
    %cst_42 = arith.constant dense<0.000000e+00> : vector<2x256xf32>
    %66 = tpu.matmul %65, %63, %cst_42 {dimension_numbers = #tpu.dot_dimension_numbers<[1], [0], [0], [1], [0, 0, 1, 1], [], []>} : vector<2x64xf32>, vector<64x256xf32>, vector<2x256xf32> -> vector<2x256xf32>
    %c1_43 = arith.constant 1 : index
    %c0_44 = arith.constant 0 : index
    %c0_45 = arith.constant 0 : index
    %67 = vector.load %arg9[%c1_43, %c0_44, %c0_45] : memref<2x2x1xf32, #tpu.memory_space<vmem>>, vector<1x2x1xf32>
    %68 = vector.shape_cast %67 : vector<1x2x1xf32> to vector<2x1xf32>
    %69 = vector.broadcast %68 : vector<2x1xf32> to vector<2x256xf32>
    %70 = arith.addf %66, %69 : vector<2x256xf32>
    %71 = vector.extract_strided_slice %70 {offsets = [0, 0], sizes = [1, 256], strides = [1, 1]} : vector<2x256xf32> to vector<1x256xf32>
    %72 = vector.extract_strided_slice %70 {offsets = [1, 0], sizes = [1, 256], strides = [1, 1]} : vector<2x256xf32> to vector<1x256xf32>
    %c1_46 = arith.constant 1 : index
    %73 = memref.load %arg1[%c1_46] : memref<2xf32, #tpu.memory_space<smem>>
    %74 = math.tanh %71 : vector<1x256xf32>
    %75 = vector.broadcast %73 : f32 to vector<1x256xf32>
    %76 = arith.mulf %75, %74 : vector<1x256xf32>
    %c1_47 = arith.constant 1 : index
    %77 = memref.load %arg2[%c1_47] : memref<2xf32, #tpu.memory_space<smem>>
    %78 = vector.broadcast %77 : f32 to vector<1x256xf32>
    %79 = arith.addf %76, %78 : vector<1x256xf32>
    %80 = math.exp %79 : vector<1x256xf32>
    %81 = arith.mulf %80, %1 : vector<1x256xf32>
    %82 = arith.addf %81, %72 : vector<1x256xf32>
    %83 = arith.addf %43, %79 : vector<1x256xf32>
    %84 = arith.mulf %82, %82 : vector<1x256xf32>
    %85 = arith.mulf %42, %42 : vector<1x256xf32>
    %86 = arith.addf %84, %85 : vector<1x256xf32>
    %cst_48 = arith.constant -5.000000e-01 : f32
    %87 = vector.broadcast %cst_48 : f32 to vector<1x256xf32>
    %88 = arith.mulf %87, %86 : vector<1x256xf32>
    %cst_49 = arith.constant 1.83787704 : f32
    %89 = vector.broadcast %cst_49 : f32 to vector<1x256xf32>
    %90 = arith.subf %88, %89 : vector<1x256xf32>
    %91 = arith.addf %83, %90 : vector<1x256xf32>
    %92 = tpu.concatenate %82, %42, %83, %91 in 0 : vector<1x256xf32>, vector<1x256xf32>, vector<1x256xf32>, vector<1x256xf32> -> vector<4x256xf32>
    %c0_50 = arith.constant 0 : index
    %c0_51 = arith.constant 0 : index
    %93 = vector.load %arg10[%c0_50, %c0_51] : memref<4x256xf32, #tpu.memory_space<vmem>>, vector<4x256xf32>
    tpu.vector_store %arg10[%c0_50, %c0_51], %92 {strides = array<i32>} : memref<4x256xf32, #tpu.memory_space<vmem>>, vector<4x256xf32>,
    return
  }
  func.func @transform_0(%arg0: i32, %arg1: memref<2xf32, #tpu.memory_space<smem>>, %arg2: memref<2xf32, #tpu.memory_space<smem>>) -> (i32, i32) {
    %c0_i32 = arith.constant 0 : i32
    %c0_i32_0 = arith.constant 0 : i32
    return %c0_i32, %arg0 : i32, i32
  }
  func.func @transform_1(%arg0: i32, %arg1: memref<2xf32, #tpu.memory_space<smem>>, %arg2: memref<2xf32, #tpu.memory_space<smem>>) -> (i32, i32, i32) {
    %c0_i32 = arith.constant 0 : i32
    %c0_i32_0 = arith.constant 0 : i32
    %c0_i32_1 = arith.constant 0 : i32
    %c0_i32_2 = arith.constant 0 : i32
    return %c0_i32, %c0_i32_0, %c0_i32_1 : i32, i32, i32
  }
  func.func @transform_2(%arg0: i32, %arg1: memref<2xf32, #tpu.memory_space<smem>>, %arg2: memref<2xf32, #tpu.memory_space<smem>>) -> (i32, i32, i32) {
    %c0_i32 = arith.constant 0 : i32
    %c0_i32_0 = arith.constant 0 : i32
    %c0_i32_1 = arith.constant 0 : i32
    %c0_i32_2 = arith.constant 0 : i32
    return %c0_i32, %c0_i32_0, %c0_i32_1 : i32, i32, i32
  }
  func.func @transform_3(%arg0: i32, %arg1: memref<2xf32, #tpu.memory_space<smem>>, %arg2: memref<2xf32, #tpu.memory_space<smem>>) -> (i32, i32, i32) {
    %c0_i32 = arith.constant 0 : i32
    %c0_i32_0 = arith.constant 0 : i32
    %c0_i32_1 = arith.constant 0 : i32
    %c0_i32_2 = arith.constant 0 : i32
    return %c0_i32, %c0_i32_0, %c0_i32_1 : i32, i32, i32
  }
  func.func @transform_4(%arg0: i32, %arg1: memref<2xf32, #tpu.memory_space<smem>>, %arg2: memref<2xf32, #tpu.memory_space<smem>>) -> (i32, i32, i32) {
    %c0_i32 = arith.constant 0 : i32
    %c0_i32_0 = arith.constant 0 : i32
    %c0_i32_1 = arith.constant 0 : i32
    %c0_i32_2 = arith.constant 0 : i32
    return %c0_i32, %c0_i32_0, %c0_i32_1 : i32, i32, i32
  }
  func.func @transform_5(%arg0: i32, %arg1: memref<2xf32, #tpu.memory_space<smem>>, %arg2: memref<2xf32, #tpu.memory_space<smem>>) -> (i32, i32, i32) {
    %c0_i32 = arith.constant 0 : i32
    %c0_i32_0 = arith.constant 0 : i32
    %c0_i32_1 = arith.constant 0 : i32
    %c0_i32_2 = arith.constant 0 : i32
    return %c0_i32, %c0_i32_0, %c0_i32_1 : i32, i32, i32
  }
  func.func @transform_6(%arg0: i32, %arg1: memref<2xf32, #tpu.memory_space<smem>>, %arg2: memref<2xf32, #tpu.memory_space<smem>>) -> (i32, i32, i32) {
    %c0_i32 = arith.constant 0 : i32
    %c0_i32_0 = arith.constant 0 : i32
    %c0_i32_1 = arith.constant 0 : i32
    %c0_i32_2 = arith.constant 0 : i32
    return %c0_i32, %c0_i32_0, %c0_i32_1 : i32, i32, i32
  }
  func.func @transform_7(%arg0: i32, %arg1: memref<2xf32, #tpu.memory_space<smem>>, %arg2: memref<2xf32, #tpu.memory_space<smem>>) -> (i32, i32) {
    %c0_i32 = arith.constant 0 : i32
    %c0_i32_0 = arith.constant 0 : i32
    return %c0_i32, %arg0 : i32, i32
  }
}

</mosaic_0001>

<bundles_post_ra>
// kernel: tpu_custom_call.1
= control target key start
LH: loop header
LB: loop body
LE: loop exit
PB: predicated region body
PF: predicated region fallthrough
CT: control target
= control target key end

     0   :  { %s1294_s15 = smov [#allocation3]   ;;  %s1295_s16 = smov [#allocation4]   ;;  %s1850_s0 = inlined_call_operand.vmem [shape: f32[2], index: 0, kind: input, shape index: {}]   ;;  %s1851_s2 = inlined_call_operand.vmem [shape: f32[2,256], index: 2, kind: input, shape index: {}]   ;;  %s1852_s3 = inlined_call_operand.vmem [shape: f32[2,128,1], index: 3, kind: input, shape index: {}]   ;;  %s1853_s4 = inlined_call_operand.vmem [shape: f32[2,128,1], index: 4, kind: input, shape index: {}]   ;;  %s1854_s5 = inlined_call_operand.vmem [shape: f32[2,64,128], index: 5, kind: input, shape index: {}]   ;;  %s1855_s6 = inlined_call_operand.vmem [shape: f32[2,64,1], index: 6, kind: input, shape index: {}]   ;;  %s1856_s7 = inlined_call_operand.vmem [shape: f32[2,2,64], index: 7, kind: input, shape index: {}]   ;;  %s1857_s8 = inlined_call_operand.vmem [shape: f32[2,2,1], index: 8, kind: input, shape index: {}]   ;;  %s1858_s9 = inlined_call_operand.hbm [shape: f32[4,256], index: 9, kind: output, shape index: {}]   ;;  %s1859_s1 = inlined_call_operand.vmem [shape: f32[2], index: 1, kind: input, shape index: {}]  }
   0x1   :  { %s15_s11 = sshll.u32 %s1850_s0, 4  ;;  %s20_s14 = sshll.u32 %s1859_s1, 4  ;;  %s16_s11 = int_to_ptr.vmem [resolvable:$true] %s15_s11  ;;  %s21_s14 = int_to_ptr.vmem [resolvable:$true] %s20_s14 }
   0x2   :  { %18 = dma.vmem_to_smem %s16_s11, 16, %s1294_s15, [#allocation2] }
   0x3   :  { %23 = dma.vmem_to_smem %s21_s14, 16, %s1295_s16, [#allocation2] }
   0x4   :  { %1290 = dma.done.wait [#allocation2], 32 }
   0x5   :  { %1291 = vsyncadd [#allocation2], 4294967264 }
   0x6   :  { %26 = sfence }
   0x7   :  { %v192_v0 = vld [vmem:[%s1853_s4 + $0x70] sm:$0xff]  ;;  %v193_v1 = vld [vmem:[%s1853_s4 + $0x78] sm:$0xff]  ;;  %v1296_v3 = vmov 0  }
   0x8   :  { %v58_v2 = vld [vmem:[%s1852_s3 + $0x78] sm:$0xff]  ;;  %1225 = vset.pattern.permute.xlu2 %v1296_v3  ;;  %1224 = vset.pattern.permute.xlu1 %v1296_v3 }
   0x9   :  { %1223 = vset.pattern.permute.xlu0 %v1296_v3  ;;  %266 = vperm.xlu2 %1225, %v192_v0  }
   0xa   :  { %271 = vperm.xlu1 %1224, %v193_v1   ;;  %136 = vperm.xlu0 %1223, %v58_v2  }
   0xb   :  { %27 = vsyncpa [#allocation6], 0  ;;  %v55_v4 = vld [vmem:[%s1852_s3 + $0x60] sm:$0xff]  ;;  %v57_v5 = vld [vmem:[%s1852_s3 + $0x70] sm:$0xff]  ;;  %vm499_vm0 = vcmask 523264   ;;  %s543_s28 = sld [smem:[#allocation3]] }
   0xc   :  { %v56_v6 = vld [vmem:[%s1852_s3 + $0x68] sm:$0xff]  ;;  %v190_v7 = vld [vmem:[%s1853_s4 + $0x60] sm:$0xff]  ;;  %v54_v9 = vld [vmem:[%s1852_s3 + $0x58] sm:$0xff]  ;;  %s549_s29 = sld [smem:[#allocation4]]  ;;  %vm1129_vm1 = vcmask 1040384   ;;  %vm1132_vm2 = vcmask 1041408  }
   0xd   :  { %v191_v8 = vld [vmem:[%s1853_s4 + $0x68] sm:$0xff]  ;;  %v189_v11 = vld [vmem:[%s1853_s4 + $0x58] sm:$0xff]  ;;  %v53_v12 = vld [vmem:[%s1852_s3 + $0x50] sm:$0xff]  ;;  %s1215_s1 = sld [smem:[#allocation3 + $0x1]]  ;;  %vm1135_vm3 = vcmask 1042432   ;;  %vm1141_vm4 = vcmask 1043456  }
   0xe   :  { %v52_v10 = vld [vmem:[%s1852_s3 + $0x48] sm:$0xff]  ;;  %v188_v14 = vld [vmem:[%s1853_s4 + $0x50] sm:$0xff]  ;;  %v51_v15 = vld [vmem:[%s1852_s3 + $0x40] sm:$0xff] }
   0xf   :  { %v187_v13 = vld [vmem:[%s1853_s4 + $0x48] sm:$0xff]  ;;  %v49_v16 = vld [vmem:[%s1852_s3 + $0x30] sm:$0xff]  ;;  %v186_v17 = vld [vmem:[%s1853_s4 + $0x40] sm:$0xff] }
  0x10   :  { %v50_v18 = vld [vmem:[%s1852_s3 + $0x38] sm:$0xff]  ;;  %v184_v19 = vld [vmem:[%s1853_s4 + $0x30] sm:$0xff]  ;;  %v48_v21 = vld [vmem:[%s1852_s3 + $0x28] sm:$0xff] }
  0x11   :  { %121 = vperm.xlu2 %1225, %v55_v4   ;;  %v185_v20 = vld [vmem:[%s1853_s4 + $0x38] sm:$0xff]  ;;  %v183_v23 = vld [vmem:[%s1853_s4 + $0x28] sm:$0xff]  ;;  %v47_v24 = vld [vmem:[%s1852_s3 + $0x20] sm:$0xff] }
  0x12   :  { %131 = vperm.xlu0 %1223, %v57_v5   ;;  %126 = vperm.xlu1 %1224, %v56_v6   ;;  %v46_v22 = vld [vmem:[%s1852_s3 + $0x18] sm:$0xff]  ;;  %v182_v26 = vld [vmem:[%s1853_s4 + $0x20] sm:$0xff]  ;;  %v45_v27 = vld [vmem:[%s1852_s3 + $0x10] sm:$0xff] }
  0x13   :  { %v181_v25 = vld [vmem:[%s1853_s4 + $0x18] sm:$0xff]  ;;  %v43_v28 = vld [vmem:[%s1852_s3] sm:$0xff]  ;;  %v180_v29 = vld [vmem:[%s1853_s4 + $0x10] sm:$0xff] }
  0x14   :  { %v44_v30 = vld [vmem:[%s1852_s3 + $0x8] sm:$0xff]  ;;  %v353_v31 = vld [vmem:[%s1855_s6 + $0x38] sm:$0xff]  ;;  %v178_v32 = vld [vmem:[%s1853_s4] sm:$0xff] }
  0x15   :  { %v179_v33 = vld [vmem:[%s1853_s4 + $0x8] sm:$0xff]  ;;  %v350_v34 = vld [vmem:[%s1855_s6 + $0x20] sm:$0xff]  ;;  %v352_v36 = vld [vmem:[%s1855_s6 + $0x30] sm:$0xff] }
  0x16   :  { %v351_v35 = vld [vmem:[%s1855_s6 + $0x28] sm:$0xff]  ;;  %v348_v38 = vld [vmem:[%s1855_s6 + $0x10] sm:$0xff]  ;;  %v349_v39 = vld [vmem:[%s1855_s6 + $0x18] sm:$0xff] }
  0x17   :  { %v347_v37 = vld [vmem:[%s1855_s6 + $0x8] sm:$0xff]  ;;  %v1178_v41 = vld [vmem:[%s1852_s3 + $0xf8] sm:$0xff]  ;;  %v493_v42 = vld [vmem:[%s1857_s8] sm:$0x3] }
  0x18   :  { %v346_v43 = vld [vmem:[%s1855_s6] sm:$0xff]  ;;  %v1176_v48 = vld [vmem:[%s1852_s3 + $0xe8] sm:$0xff]  ;;  %v1194_v49 = vld [vmem:[%s1853_s4 + $0xf8] sm:$0xff] }
  0x19   :  { %256 = vperm.xlu2 %1225, %v190_v7   ;;  %v1483_v44 = vld [vmem:[%s1851_s2] sm:$0xf]  ;;  %v1177_v50 = vld [vmem:[%s1852_s3 + $0xf0] sm:$0xff]  ;;  %v1192_v58 = vld [vmem:[%s1853_s4 + $0xe8] sm:$0xff] }
  0x1a   :  { %261 = vperm.xlu0 %1223, %v191_v8   ;;  %116 = vperm.xlu1 %1224, %v54_v9   ;;  %v140_v46 = vperm.slane %v1483_v44, 0  ;;  %v141_v47 = vperm.slane %v1483_v44, 2  ;;  %v1175_v59 = vld [vmem:[%s1852_s3 + $0xe0] sm:$0xff]  ;;  %v1193_v60 = vld [vmem:[%s1853_s4 + $0xf0] sm:$0xff]  ;;  %v1174_v8 = vld [vmem:[%s1852_s3 + $0xd8] sm:$0xff] }
  0x1b   :  { %v1173_v5 = vld [vmem:[%s1852_s3 + $0xd0] sm:$0xff]  ;;  %v1191_v7 = vld [vmem:[%s1853_s4 + $0xe0] sm:$0xff] }
  0x1c   :  { %v1498_v51 = vperm.slane %v140_v46, 0  ;;  %v1502_v52 = vperm.slane %v141_v47, 0 }
  0x21   :  { %106 = vperm.xlu2 %1225, %v52_v10  }
  0x22   :  { %251 = vperm.xlu1 %1224, %v189_v11   ;;  %111 = vperm.xlu0 %1223, %v53_v12  }
  0x29   :  { %241 = vperm.xlu2 %1225, %v187_v13  }
  0x2a   :  { %246 = vperm.xlu0 %1223, %v188_v14   ;;  %101 = vperm.xlu1 %1224, %v51_v15  }
  0x31   :  { %91 = vperm.xlu2 %1225, %v49_v16  }
  0x32   :  { %236 = vperm.xlu1 %1224, %v186_v17   ;;  %96 = vperm.xlu0 %1223, %v50_v18  }
  0x39   :  { %226 = vperm.xlu2 %1225, %v184_v19  }
  0x3a   :  { %231 = vperm.xlu0 %1223, %v185_v20   ;;  %86 = vperm.xlu1 %1224, %v48_v21  }
  0x41   :  { %76 = vperm.xlu2 %1225, %v46_v22  }
  0x42   :  { %221 = vperm.xlu1 %1224, %v183_v23   ;;  %81 = vperm.xlu0 %1223, %v47_v24  }
  0x49   :  { %211 = vperm.xlu2 %1225, %v181_v25   ;;  %v1172_v25 = vld [vmem:[%s1852_s3 + $0xc8] sm:$0xff] }
  0x4a   :  { %216 = vperm.xlu0 %1223, %v182_v26   ;;  %71 = vperm.xlu1 %1224, %v45_v27   ;;  %v1190_v26 = vld [vmem:[%s1853_s4 + $0xd8] sm:$0xff]  ;;  %v1189_v27 = vld [vmem:[%s1853_s4 + $0xd0] sm:$0xff] }
  0x51   :  { %61 = vperm.xlu2 %1225, %v43_v28  }
  0x52   :  { %206 = vperm.xlu1 %1224, %v180_v29   ;;  %66 = vperm.xlu0 %1223, %v44_v30  }
  0x59   :  { %391 = vperm.xlu2 %1225, %v353_v31  }
  0x5a   :  { %196 = vperm.xlu1 %1224, %v178_v32   ;;  %201 = vperm.xlu0 %1223, %v179_v33  }
  0x61   :  { %376 = vperm.xlu2 %1225, %v350_v34  }
  0x62   :  { %381 = vperm.xlu1 %1224, %v351_v35   ;;  %386 = vperm.xlu0 %1223, %v352_v36  }
  0x63   :  { %v267_v40 = vpop.permute.xlu2 %266 }
  0x69   :  { %361 = vperm.xlu2 %1225, %v347_v37  }
  0x6a   :  { %366 = vperm.xlu1 %1224, %v348_v38   ;;  %371 = vperm.xlu0 %1223, %v349_v39   ;;  %v1188_v39 = vld [vmem:[%s1853_s4 + $0xc8] sm:$0xff] }
  0x6b   :  { %v122_v45 = vpop.permute.xlu2 %121 }
  0x6c   :  { %v170_v11 = vmul.f32 %v1498_v51, %v122_v45  ;;  %v171_v14 = vmul.f32 %v1502_v52, %v122_v45 }
  0x71   :  { %667 = vperm.xlu2 %1225, %v1178_v41   ;;  %v1170_v41 = vld [vmem:[%s1852_s3 + $0xb8] sm:$0xff] }
  0x72   :  { %496 = vperm.xlu1 %1224, %v493_v42   ;;  %356 = vperm.xlu0 %1223, %v346_v43  }
  0x73   :  { %v257_v55 = vpop.permute.xlu2 %256 }
  0x74   :  { %v298_v19 = vadd.f32 %v257_v55, %v170_v11  ;;  %v299_v22 = vadd.f32 %v257_v55, %v171_v14  ;;  %v1168_v11 = vld [vmem:[%s1852_s3 + $0xa8] sm:$0xff] }
  0x76   :  { %v330_v29 = vmax.f32 %v298_v19, 0.0  ;;  %v331_v30 = vmax.f32 %v299_v22, 0.0 }
  0x79   :  { %657 = vperm.xlu2 %1225, %v1176_v48  }
  0x7a   :  { %798 = vperm.xlu1 %1224, %v1194_v49   ;;  %662 = vperm.xlu0 %1223, %v1177_v50  }
  0x7b   :  { %v107_v6 = vpop.permute.xlu2 %106 }
  0x7c   :  { %v272_v53 = vpop.permute.xlu1 %271  ;;  %v137_v54 = vpop.permute.xlu0 %136  ;;  %v164_v42 = vmul.f32 %v1498_v51, %v107_v6  ;;  %v165_v43 = vmul.f32 %v1502_v52, %v107_v6 }
  0x7d   :  { %v176_v56 = vmul.f32 %v1498_v51, %v137_v54  ;;  %v177_v57 = vmul.f32 %v1502_v52, %v137_v54 }
  0x7f   :  { %v304_v61 = vadd.f32 %v272_v53, %v176_v56  ;;  %v305_v62 = vadd.f32 %v272_v53, %v177_v57 }
  0x81   :  { %788 = vperm.xlu2 %1225, %v1192_v58   ;;  %v336_v63 = vmax.f32 %v304_v61, 0.0  ;;  %v337_v0 = vmax.f32 %v305_v62, 0.0  ;;  %v1187_v61 = vld [vmem:[%s1853_s4 + $0xc0] sm:$0xff]  ;;  %v1186_v62 = vld [vmem:[%s1853_s4 + $0xb8] sm:$0xff] }
  0x82   :  { %652 = vperm.xlu1 %1224, %v1175_v59   ;;  %793 = vperm.xlu0 %1223, %v1193_v60   ;;  %v1169_v60 = vld [vmem:[%s1852_s3 + $0xb0] sm:$0xff] }
  0x83   :  { %394 = vmatpush.msra.mxu0 %v336_v63  ;;  %435 = vmatpush.msra.mxu1 %v337_v0  ;;  %v242_v28 = vpop.permute.xlu2 %241 }
  0x84   :  { %v132_v1 = vpop.permute.xlu0 %131  ;;  %v127_v2 = vpop.permute.xlu1 %126  ;;  %v292_v54 = vadd.f32 %v242_v28, %v164_v42  ;;  %v293_v57 = vadd.f32 %v242_v28, %v165_v43  ;;  %v1183_v28 = vld [vmem:[%s1853_s4 + $0xa0] sm:$0xff] }
  0x85   :  { %v174_v3 = vmul.f32 %v1498_v51, %v132_v1  ;;  %v175_v4 = vmul.f32 %v1502_v52, %v132_v1  ;;  %v172_v15 = vmul.f32 %v1498_v51, %v127_v2  ;;  %v173_v16 = vmul.f32 %v1502_v52, %v127_v2 }
  0x86   :  { %v324_v63 = vmax.f32 %v292_v54, 0.0  ;;  %v325_v0 = vmax.f32 %v293_v57, 0.0 }
  0x87   :  { %v302_v9 = vadd.f32 %v267_v40, %v174_v3  ;;  %v303_v10 = vadd.f32 %v267_v40, %v175_v4  ;;  %v1171_v40 = vld [vmem:[%s1852_s3 + $0xc0] sm:$0xff] }
  0x89   :  { %642 = vperm.xlu2 %1225, %v1173_v5   ;;  %v334_v12 = vmax.f32 %v302_v9, 0.0  ;;  %v335_v13 = vmax.f32 %v303_v10, 0.0  ;;  %v1185_v10 = vld [vmem:[%s1853_s4 + $0xb0] sm:$0xff] }
  0x8a   :  { %783 = vperm.xlu1 %1224, %v1191_v7   ;;  %647 = vperm.xlu0 %1223, %v1174_v8  }
  0x8b   :  { %395 = vmatpush.msra.mxu0 %v334_v12  ;;  %436 = vmatpush.msra.mxu1 %v335_v13  ;;  %v92_v45 = vpop.permute.xlu2 %91  ;;  %v1167_v12 = vld [vmem:[%s1852_s3 + $0xa0] sm:$0xff] }
  0x8c   :  { %v262_v17 = vpop.permute.xlu0 %261  ;;  %v117_v18 = vpop.permute.xlu1 %116  ;;  %v158_v13 = vmul.f32 %v1498_v51, %v92_v45 }
  0x8d   :  { %v300_v20 = vadd.f32 %v262_v17, %v172_v15  ;;  %v301_v21 = vadd.f32 %v262_v17, %v173_v16  ;;  %v168_v31 = vmul.f32 %v1498_v51, %v117_v18  ;;  %v169_v32 = vmul.f32 %v1502_v52, %v117_v18 }
  0x8e   :  { %v159_v16 = vmul.f32 %v1502_v52, %v92_v45 }
  0x8f   :  { %v332_v23 = vmax.f32 %v300_v20, 0.0  ;;  %v333_v24 = vmax.f32 %v301_v21, 0.0 }
  0x91   :  { %396 = vmatpush.msra.mxu0 %v332_v23  ;;  %437 = vmatpush.msra.mxu1 %v333_v24 }
  0x92   :  { %637 = vperm.xlu1 %1224, %v1172_v25   ;;  %778 = vperm.xlu0 %1223, %v1190_v26   ;;  %v1166_v25 = vld [vmem:[%s1852_s3 + $0x98] sm:$0xff]  ;;  %v1184_v26 = vld [vmem:[%s1853_s4 + $0xa8] sm:$0xff] }
  0x93   :  { %773 = vperm.xlu2 %1225, %v1189_v27   ;;  %397 = vmatpush.msra.mxu0 %v330_v29  ;;  %v227_v7 = vpop.permute.xlu2 %226 }
  0x94   :  { %438 = vmatpush.msra.mxu1 %v331_v30  ;;  %v252_v33 = vpop.permute.xlu1 %251  ;;  %v112_v34 = vpop.permute.xlu0 %111  ;;  %v286_v19 = vadd.f32 %v227_v7, %v158_v13  ;;  %v287_v22 = vadd.f32 %v227_v7, %v159_v16 }
  0x95   :  { %v296_v35 = vadd.f32 %v252_v33, %v168_v31  ;;  %v297_v36 = vadd.f32 %v252_v33, %v169_v32  ;;  %v166_v48 = vmul.f32 %v1498_v51, %v112_v34  ;;  %v167_v49 = vmul.f32 %v1502_v52, %v112_v34 }
  0x96   :  { %v318_v29 = vmax.f32 %v286_v19, 0.0  ;;  %v319_v30 = vmax.f32 %v287_v22, 0.0 }
  0x97   :  { %v328_v37 = vmax.f32 %v296_v35, 0.0  ;;  %v329_v38 = vmax.f32 %v297_v36, 0.0 }
  0x99   :  { %398 = vmatpush.msra.mxu0 %v328_v37  ;;  %439 = vmatpush.msra.mxu1 %v329_v38 }
  0x9a   :  { %768 = vperm.xlu1 %1224, %v1188_v39   ;;  %632 = vperm.xlu0 %1223, %v1171_v40   ;;  %v1182_v39 = vld [vmem:[%s1853_s4 + $0x98] sm:$0xff]  ;;  %v1165_v40 = vld [vmem:[%s1852_s3 + $0x90] sm:$0xff] }
  0x9b   :  { %627 = vperm.xlu2 %1225, %v1170_v41   ;;  %v77_v27 = vpop.permute.xlu2 %76  ;;  %v1164_v41 = vld [vmem:[%s1852_s3 + $0x88] sm:$0xff] }
  0x9c   :  { %v247_v50 = vpop.permute.xlu0 %246  ;;  %v102_v53 = vpop.permute.xlu1 %101  ;;  %v152_v43 = vmul.f32 %v1498_v51, %v77_v27 }
  0x9d   :  { %v294_v55 = vadd.f32 %v247_v50, %v166_v48  ;;  %v295_v56 = vadd.f32 %v247_v50, %v167_v49  ;;  %v162_v1 = vmul.f32 %v1498_v51, %v102_v53  ;;  %v163_v2 = vmul.f32 %v1502_v52, %v102_v53 }
  0x9e   :  { %v153_v49 = vmul.f32 %v1502_v52, %v77_v27  ;;  %v338_v27 = vld [vmem:[%s1854_s5] sm:$0xff] }
  0x9f   :  { %v326_v58 = vmax.f32 %v294_v55, 0.0  ;;  %v327_v59 = vmax.f32 %v295_v56, 0.0 }
  0xa1   :  { %399 = vmatpush.msra.mxu0 %v326_v58  ;;  %440 = vmatpush.msra.mxu1 %v327_v59 }
  0xa2   :  { %622 = vperm.xlu1 %1224, %v1169_v60   ;;  %763 = vperm.xlu0 %1223, %v1187_v61   ;;  %v1163_v60 = vld [vmem:[%s1852_s3 + $0x80] sm:$0xff]  ;;  %v1181_v61 = vld [vmem:[%s1853_s4 + $0x90] sm:$0xff] }
  0xa3   :  { %758 = vperm.xlu2 %1225, %v1186_v62   ;;  %400 = vmatpush.msra.mxu0 %v324_v63  ;;  %v212_v42 = vpop.permute.xlu2 %211  ;;  %v1180_v62 = vld [vmem:[%s1853_s4 + $0x88] sm:$0xff] }
  0xa4   :  { %441 = vmatpush.msra.mxu1 %v325_v0  ;;  %v237_v3 = vpop.permute.xlu1 %236  ;;  %v97_v4 = vpop.permute.xlu0 %96  ;;  %v280_v54 = vadd.f32 %v212_v42, %v152_v43  ;;  %v281_v57 = vadd.f32 %v212_v42, %v153_v49 }
  0xa5   :  { %v290_v5 = vadd.f32 %v237_v3, %v162_v1  ;;  %v291_v6 = vadd.f32 %v237_v3, %v163_v2  ;;  %v160_v14 = vmul.f32 %v1498_v51, %v97_v4  ;;  %v161_v15 = vmul.f32 %v1502_v52, %v97_v4 }
  0xa6   :  { %v312_v63 = vmax.f32 %v280_v54, 0.0  ;;  %v313_v0 = vmax.f32 %v281_v57, 0.0 }
  0xa7   :  { %v322_v8 = vmax.f32 %v290_v5, 0.0  ;;  %v323_v9 = vmax.f32 %v291_v6, 0.0 }
  0xa9   :  { %401 = vmatpush.msra.mxu0 %v322_v8  ;;  %442 = vmatpush.msra.mxu1 %v323_v9  ;;  %v1210_v9 = vld [vmem:[%s1855_s6 + $0x78] sm:$0xff] }
  0xaa   :  { %753 = vperm.xlu1 %1224, %v1185_v10   ;;  %617 = vperm.xlu0 %1223, %v1168_v11   ;;  %v1179_v10 = vld [vmem:[%s1853_s4 + $0x80] sm:$0xff]  ;;  %s1152_s4 = sshll.u32 %s1858_s9, 4  ;;  %s1153_s4 = int_to_ptr.hbm [resolvable:$true] %s1152_s4 }
  0xab   :  { %612 = vperm.xlu2 %1225, %v1167_v12   ;;  %v62_v11 = vpop.permute.xlu2 %61  ;;  %v1209_v12 = vld [vmem:[%s1855_s6 + $0x70] sm:$0xff] }
  0xac   :  { %v232_v17 = vpop.permute.xlu0 %231  ;;  %v87_v18 = vpop.permute.xlu1 %86  ;;  %v146_v13 = vmul.f32 %v1498_v51, %v62_v11  ;;  %v147_v16 = vmul.f32 %v1502_v52, %v62_v11 }
  0xad   :  { %v288_v20 = vadd.f32 %v232_v17, %v160_v14  ;;  %v289_v21 = vadd.f32 %v232_v17, %v161_v15  ;;  %v156_v31 = vmul.f32 %v1498_v51, %v87_v18  ;;  %v157_v32 = vmul.f32 %v1502_v52, %v87_v18 }
  0xaf   :  { %v320_v23 = vmax.f32 %v288_v20, 0.0  ;;  %v321_v24 = vmax.f32 %v289_v21, 0.0 }
  0xb1   :  { %402 = vmatpush.msra.mxu0 %v320_v23  ;;  %443 = vmatpush.msra.mxu1 %v321_v24 }
  0xb2   :  { %607 = vperm.xlu1 %1224, %v1166_v25   ;;  %748 = vperm.xlu0 %1223, %v1184_v26   ;;  %v1207_v25 = vld [vmem:[%s1855_s6 + $0x60] sm:$0xff] }
  0xb3   :  { %743 = vperm.xlu2 %1225, %v1183_v28   ;;  %403 = vmatpush.msra.mxu0 %v318_v29  ;;  %v1204_v29 = vld [vmem:[%s1855_s6 + $0x48] sm:$0xff]  ;;  %v392_v57 = vpop.permute.xlu2 %391 }
  0xb4   :  { %444 = vmatpush.msra.mxu1 %v319_v30  ;;  %v222_v33 = vpop.permute.xlu1 %221  ;;  %v82_v34 = vpop.permute.xlu0 %81  ;;  %v1205_v30 = vld [vmem:[%s1855_s6 + $0x50] sm:$0xff] }
  0xb5   :  { %v284_v35 = vadd.f32 %v222_v33, %v156_v31  ;;  %v285_v36 = vadd.f32 %v222_v33, %v157_v32  ;;  %v154_v45 = vmul.f32 %v1498_v51, %v82_v34  ;;  %v155_v48 = vmul.f32 %v1502_v52, %v82_v34  ;;  %v1203_v31 = vld [vmem:[%s1855_s6 + $0x40] sm:$0xff]  ;;  %v339_v32 = vld [vmem:[%s1854_s5 + $0x8] sm:$0xff]  ;;  %v340_v34 = vld [vmem:[%s1854_s5 + $0x10] sm:$0xff] }
  0xb6   :  { %v1212_v33 = vld [vmem:[%s1857_s8 + $0x2] sm:$0x3]  ;;  %s1216_s8 = sld [smem:[#allocation4 + $0x1]] }
  0xb7   :  { %v316_v37 = vmax.f32 %v284_v35, 0.0  ;;  %v317_v38 = vmax.f32 %v285_v36, 0.0  ;;  %v341_v35 = vld [vmem:[%s1854_s5 + $0x18] sm:$0xff]  ;;  %v342_v36 = vld [vmem:[%s1854_s5 + $0x20] sm:$0xff] }
  0xb9   :  { %404 = vmatpush.msra.mxu0 %v316_v37  ;;  %445 = vmatpush.msra.mxu1 %v317_v38  ;;  %v343_v37 = vld [vmem:[%s1854_s5 + $0x28] sm:$0xff]  ;;  %v344_v38 = vld [vmem:[%s1854_s5 + $0x30] sm:$0xff] }
  0xba   :  { %738 = vperm.xlu1 %1224, %v1182_v39   ;;  %602 = vperm.xlu0 %1223, %v1165_v40   ;;  %v345_v39 = vld [vmem:[%s1854_s5 + $0x38] sm:$0xff] }
  0xbb   :  { %597 = vperm.xlu2 %1225, %v1164_v41  }
  0xbc   :  { %v217_v50 = vpop.permute.xlu0 %216  ;;  %v72_v53 = vpop.permute.xlu1 %71 }
  0xbd   :  { %v282_v55 = vadd.f32 %v217_v50, %v154_v45  ;;  %v283_v56 = vadd.f32 %v217_v50, %v155_v48  ;;  %v150_v1 = vmul.f32 %v1498_v51, %v72_v53  ;;  %v151_v2 = vmul.f32 %v1502_v52, %v72_v53 }
  0xbf   :  { %v314_v58 = vmax.f32 %v282_v55, 0.0  ;;  %v315_v59 = vmax.f32 %v283_v56, 0.0 }
  0xc1   :  { %405 = vmatpush.msra.mxu0 %v314_v58  ;;  %446 = vmatpush.msra.mxu1 %v315_v59 }
  0xc2   :  { %592 = vperm.xlu1 %1224, %v1163_v60   ;;  %733 = vperm.xlu0 %1223, %v1181_v61  }
  0xc3   :  { %728 = vperm.xlu2 %1225, %v1180_v62   ;;  %406 = vmatpush.msra.mxu0 %v312_v63  ;;  %v377_v62 = vpop.permute.xlu2 %376 }
  0xc4   :  { %447 = vmatpush.msra.mxu1 %v313_v0  ;;  %v207_v3 = vpop.permute.xlu1 %206  ;;  %v67_v4 = vpop.permute.xlu0 %66 }
  0xc5   :  { %v278_v5 = vadd.f32 %v207_v3, %v150_v1  ;;  %v279_v6 = vadd.f32 %v207_v3, %v151_v2  ;;  %v148_v14 = vmul.f32 %v1498_v51, %v67_v4  ;;  %v149_v15 = vmul.f32 %v1502_v52, %v67_v4  ;;  %v1208_v51 = vld [vmem:[%s1855_s6 + $0x68] sm:$0xff]  ;;  %v1206_v52 = vld [vmem:[%s1855_s6 + $0x58] sm:$0xff] }
  0xc7   :  { %v310_v7 = vmax.f32 %v278_v5, 0.0  ;;  %v311_v8 = vmax.f32 %v279_v6, 0.0 }
  0xc9   :  { %407 = vmatpush.msra.mxu0 %v310_v7  ;;  %448 = vmatpush.msra.mxu1 %v311_v8 }
  0xca   :  { %920 = vperm.xlu1 %1224, %v1210_v9   ;;  %723 = vperm.xlu0 %1223, %v1179_v10  }
  0xcb   :  { %915 = vperm.xlu2 %1225, %v1209_v12  }
  0xcc   :  { %v197_v17 = vpop.permute.xlu1 %196  ;;  %v202_v18 = vpop.permute.xlu0 %201 }
  0xcd   :  { %v274_v19 = vadd.f32 %v197_v17, %v146_v13  ;;  %v276_v20 = vadd.f32 %v202_v18, %v148_v14  ;;  %v277_v21 = vadd.f32 %v202_v18, %v149_v15  ;;  %v275_v22 = vadd.f32 %v197_v17, %v147_v16 }
  0xcf   :  { %v308_v23 = vmax.f32 %v276_v20, 0.0  ;;  %v309_v24 = vmax.f32 %v277_v21, 0.0  ;;  %v306_v26 = vmax.f32 %v274_v19, 0.0  ;;  %v307_v28 = vmax.f32 %v275_v22, 0.0  ;;  %v362_v21 = vpop.permute.xlu2 %361 }
  0xd1   :  { %408 = vmatpush.msra.mxu0 %v308_v23  ;;  %449 = vmatpush.msra.mxu1 %v309_v24 }
  0xd2   :  { %905 = vperm.xlu1 %1224, %v1207_v25   ;;  %910 = vperm.xlu0 %1223, %v1208_v51  }
  0xd3   :  { %900 = vperm.xlu2 %1225, %v1206_v52   ;;  %409 = vmatpush.msra.mxu0 %v306_v26 }
  0xd4   :  { %450 = vmatpush.msra.mxu1 %v307_v28  ;;  %410 = vmatmul.f32.vlgmr.msra.gmra.mxu0 %v338_v27  ;;  %v387_v58 = vpop.permute.xlu0 %386  ;;  %v382_v61 = vpop.permute.xlu1 %381 }
  0xd5   :  { %451 = vmatmul.f32.vlgmr.msra.gmra.mxu1 %v338_v27 }
  0xda   :  { %890 = vperm.xlu1 %1224, %v1204_v29   ;;  %895 = vperm.xlu0 %1223, %v1205_v30  }
  0xdb   :  { %885 = vperm.xlu2 %1225, %v1203_v31  }
  0xdc   :  { %413 = vmatmul.f32.gmra.mxu0 %v339_v32  ;;  %v372_v3 = vpop.permute.xlu0 %371  ;;  %v367_v16 = vpop.permute.xlu1 %366 }
  0xdd   :  { %454 = vmatmul.f32.gmra.mxu1 %v339_v32 }
  0xe2   :  { %1027 = vperm.xlu0 %1223, %v1212_v33  }
  0xe4   :  { %416 = vmatmul.f32.gmra.mxu0 %v340_v34  ;;  %v357_v51 = vpop.permute.xlu0 %356 }
  0xe5   :  { %457 = vmatmul.f32.gmra.mxu1 %v340_v34  ;;  %v492_v34 = vld [vmem:[%s1856_s7] sm:$0x3] }
  0xec   :  { %419 = vmatmul.f32.gmra.mxu0 %v341_v35 }
  0xed   :  { %460 = vmatmul.f32.gmra.mxu1 %v341_v35 }
  0xf4   :  { %422 = vmatmul.f32.gmra.mxu0 %v342_v36 }
  0xf5   :  { %463 = vmatmul.f32.gmra.mxu1 %v342_v36  ;;  %v497_v36 = vpop.permute.xlu1 %496 }
  0xfc   :  { %425 = vmatmul.f32.gmra.mxu0 %v343_v37 }
  0xfd   :  { %466 = vmatmul.f32.gmra.mxu1 %v343_v37  ;;  %v668_v37 = vpop.permute.xlu2 %667 }
 0x104   :  { %428 = vmatmul.f32.gmra.mxu0 %v344_v38 }
 0x105   :  { %469 = vmatmul.f32.gmra.mxu1 %v344_v38  ;;  %v663_v38 = vpop.permute.xlu0 %662 }
 0x10c   :  { %431 = vmatmul.f32.gmra.mxu0 %v345_v39 }
 0x10d   :  { %472 = vmatmul.f32.gmra.mxu1 %v345_v39  ;;  %v799_v39 = vpop.permute.xlu1 %798 }
 0x151   :  { %v411_v40 = vpop.f32.mrf.mxu0 }
 0x152   :  { %v452_v41 = vpop.f32.mrf.mxu1  ;;  %v412_v27 = vadd.f32 %v411_v40, %v357_v51  ;;  %v658_v40 = vpop.permute.xlu2 %657 }
 0x153   :  { %v453_v29 = vadd.f32 %v452_v41, %v357_v51  ;;  %v794_v41 = vpop.permute.xlu0 %793 }
 0x154   :  { %v476_v33 = vmax.f32 %v412_v27, 0.0 }
 0x155   :  { %v477_v35 = vmax.f32 %v453_v29, 0.0 }
 0x159   :  { %v414_v42 = vpop.f32.mrf.mxu0 }
 0x15a   :  { %v455_v43 = vpop.f32.mrf.mxu1  ;;  %v415_v24 = vadd.f32 %v414_v42, %v362_v21  ;;  %v653_v42 = vpop.permute.xlu1 %652 }
 0x15b   :  { %v456_v52 = vadd.f32 %v455_v43, %v362_v21  ;;  %v1676_v43 = vpop.permute.xlu2 %788 }
 0x15c   :  { %v478_v31 = vmax.f32 %v415_v24, 0.0 }
 0x15d   :  { %v479_v32 = vmax.f32 %v456_v52, 0.0 }
 0x161   :  { %v417_v45 = vpop.f32.mrf.mxu0 }
 0x162   :  { %v458_v48 = vpop.f32.mrf.mxu1  ;;  %v418_v19 = vadd.f32 %v417_v45, %v367_v16  ;;  %v1678_v45 = vpop.permute.xlu0 %647 }
 0x163   :  { %v459_v22 = vadd.f32 %v458_v48, %v367_v16  ;;  %v1680_v48 = vpop.permute.xlu1 %783 }
 0x164   :  { %v480_v28 = vmax.f32 %v418_v19, 0.0 }
 0x165   :  { %v481_v30 = vmax.f32 %v459_v22, 0.0 }
 0x169   :  { %v420_v49 = vpop.f32.mrf.mxu0 }
 0x16a   :  { %v461_v50 = vpop.f32.mrf.mxu1  ;;  %v421_v14 = vadd.f32 %v420_v49, %v372_v3  ;;  %v1682_v49 = vpop.permute.xlu2 %642 }
 0x16b   :  { %v462_v17 = vadd.f32 %v461_v50, %v372_v3  ;;  %v1684_v50 = vpop.permute.xlu0 %778 }
 0x16c   :  { %v482_v25 = vmax.f32 %v421_v14, 0.0 }
 0x16d   :  { %v483_v26 = vmax.f32 %v462_v17, 0.0 }
 0x171   :  { %v423_v53 = vpop.f32.mrf.mxu0 }
 0x172   :  { %v464_v54 = vpop.f32.mrf.mxu1  ;;  %v424_v10 = vadd.f32 %v423_v53, %v377_v62  ;;  %v1686_v53 = vpop.permute.xlu1 %637 }
 0x173   :  { %v465_v12 = vadd.f32 %v464_v54, %v377_v62  ;;  %v1688_v54 = vpop.permute.xlu2 %773  ;;  %v546_v62 = vstv %s543_s28 }
 0x174   :  { %v484_v20 = vmax.f32 %v424_v10, 0.0 }
 0x175   :  { %v485_v23 = vmax.f32 %v465_v12, 0.0  ;;  %v557_v12 = vperm.slane %v1483_v44, 1 }
 0x179   :  { %v426_v55 = vpop.f32.mrf.mxu0 }
 0x17a   :  { %v467_v56 = vpop.f32.mrf.mxu1  ;;  %v427_v6 = vadd.f32 %v426_v55, %v382_v61  ;;  %v1690_v55 = vpop.permute.xlu0 %632 }
 0x17b   :  { %v468_v8 = vadd.f32 %v467_v56, %v382_v61  ;;  %v1694_v61 = vpop.permute.xlu2 %627 }
 0x17c   :  { %v486_v15 = vmax.f32 %v427_v6, 0.0 }
 0x17d   :  { %v487_v18 = vmax.f32 %v468_v8, 0.0 }
 0x181   :  { %v429_v59 = vpop.f32.mrf.mxu0 }
 0x182   :  { %v470_v60 = vpop.f32.mrf.mxu1  ;;  %v430_v0 = vadd.f32 %v429_v59, %v387_v58 }
 0x183   :  { %v471_v4 = vadd.f32 %v470_v60, %v387_v58  ;;  %v1692_v60 = vpop.permute.xlu1 %768  ;;  %v1706_v10 = vpop.permute.xlu2 %758 }
 0x184   :  { %v488_v11 = vmax.f32 %v430_v0, 0.0 }
 0x185   :  { %v489_v13 = vmax.f32 %v471_v4, 0.0 }
 0x189   :  { %v432_v63 = vpop.f32.mrf.mxu0 }
 0x18a   :  { %v473_v1 = vpop.f32.mrf.mxu1  ;;  %v433_v2 = vadd.f32 %v432_v63, %v392_v57  ;;  %v1696_v63 = vpop.permute.xlu0 %763 }
 0x18b   :  { %v474_v5 = vadd.f32 %v473_v1, %v392_v57  ;;  %v550_v1 = vstv %s549_s29  ;;  %v1716_v22 = vpop.permute.xlu2 %612 }
 0x18c   :  { %v490_v7 = vmax.f32 %v433_v2, 0.0 }
 0x18d   :  { %v491_v9 = vmax.f32 %v474_v5, 0.0 }
 0x18e   :  { %511 = vmatpush.msra.mxu2 %v490_v7  ;;  %v1702_v7 = vpop.permute.xlu1 %622 }
 0x18f   :  { %531 = vmatpush.msra.mxu3 %v491_v9 }
 0x190   :  { %512 = vmatpush.msra.mxu2 %v488_v11 }
 0x191   :  { %532 = vmatpush.msra.mxu3 %v489_v13  ;;  %v558_v13 = vperm.slane %v1483_v44, 3 }
 0x192   :  { %513 = vmatpush.msra.mxu2 %v486_v15  ;;  %v1708_v11 = vpop.permute.xlu0 %617 }
 0x193   :  { %533 = vmatpush.msra.mxu3 %v487_v18 }
 0x194   :  { %514 = vmatpush.msra.mxu2 %v484_v20 }
 0x195   :  { %534 = vmatpush.msra.mxu3 %v485_v23 }
 0x196   :  { %515 = vmatpush.msra.mxu2 %v482_v25  ;;  %v1712_v18 = vpop.permute.xlu1 %753 }
 0x197   :  { %535 = vmatpush.msra.mxu3 %v483_v26 }
 0x198   :  { %516 = vmatpush.msra.mxu2 %v480_v28 }
 0x199   :  { %536 = vmatpush.msra.mxu3 %v481_v30 }
 0x19a   :  { %517 = vmatpush.msra.mxu2 %v478_v31  ;;  %v1723_v25 = vpop.permute.xlu0 %748 }
 0x19b   :  { %537 = vmatpush.msra.mxu3 %v479_v32 }
 0x19c   :  { %518 = vmatpush.msra.mxu2 %v476_v33 }
 0x19d   :  { %538 = vmatpush.msra.mxu3 %v477_v35  ;;  %1161 = vmatmul.msk.f32.vlgmr.msra.gmra.mxu2 %vm499_vm0, %v492_v34 }
 0x19e   :  { %1162 = vmatmul.msk.f32.vlgmr.msra.gmra.mxu3 %vm499_vm0, %v492_v34 }
 0x220   :  { %v520_v56 = vpop.f32.mrf.mxu2 }
 0x221   :  { %v521_v57 = vadd.f32 %v520_v56, %v497_v36  ;;  %v540_v58 = vpop.f32.mrf.mxu3 }
 0x222   :  { %v541_v59 = vadd.f32 %v540_v58, %v497_v36  ;;  %v1737_v58 = vpop.permute.xlu1 %607 }
 0x223   :  { %1226 = vtanh.f32 %v521_v57  ;;  %v565_v17 = vrot.slane %v521_v57, 1 }
 0x224   :  { %1228 = vtanh.f32 %v541_v59  ;;  %v566_v20 = vrot.slane %v541_v59, 1 }
 0x229   :  { %v1227_v0 = vpop.eup %1226 }
 0x22a   :  { %v1229_v2 = vpop.eup %1228  ;;  %v547_v3 = vmul.f32 %v1227_v0, %v546_v62 }
 0x22b   :  { %v548_v4 = vmul.f32 %v1229_v2, %v546_v62 }
 0x22c   :  { %v1698_v5 = vadd.f32 %v550_v1, %v547_v3 }
 0x22d   :  { %v1700_v6 = vadd.f32 %v550_v1, %v548_v4 }
 0x22e   :  { %v553_v8 = vmul.f32 1.442695, %v1698_v5 }
 0x22f   :  { %v555_v9 = vmul.f32 1.442695, %v1700_v6 }
 0x230   :  { %1230 = vpow2.f32 %v553_v8 }
 0x231   :  { %1232 = vpow2.f32 %v555_v9 }
 0x236   :  { %v1231_v14 = vpop.eup %1230 }
 0x237   :  { %v1233_v15 = vpop.eup %1232  ;;  %v561_v16 = vmul.f32 %v1231_v14, %v557_v12 }
 0x238   :  { %v562_v19 = vmul.f32 %v1233_v15, %v558_v13 }
 0x239   :  { %v1714_v21 = vadd.f32 %v565_v17, %v561_v16 }
 0x23a   :  { %v1718_v23 = vadd.f32 %v566_v20, %v562_v19 }
 0x23b   :  { %v1721_v24 = vperm.slane %v1714_v21, 0 }
 0x23c   :  { %v1726_v51 = vperm.slane %v1718_v23, 0 }
 0x23d   :  { %v702_v52 = vmul.f32 %v1721_v24, %v668_v37  ;;  %v700_v26 = vmul.f32 %v1721_v24, %v663_v38  ;;  %v698_v27 = vmul.f32 %v1721_v24, %v658_v40  ;;  %v696_v31 = vmul.f32 %v1721_v24, %v653_v42 }
 0x23e   :  { %v703_v28 = vmul.f32 %v1726_v51, %v668_v37  ;;  %v701_v29 = vmul.f32 %v1726_v51, %v663_v38  ;;  %v699_v30 = vmul.f32 %v1726_v51, %v658_v40  ;;  %v697_v36 = vmul.f32 %v1726_v51, %v653_v42  ;;  %v1747_v42 = vpop.permute.xlu2 %743 }
 0x23f   :  { %v831_v32 = vadd.f32 %v799_v39, %v702_v52  ;;  %v829_v33 = vadd.f32 %v794_v41, %v700_v26  ;;  %v827_v57 = vadd.f32 %v1676_v43, %v698_v27  ;;  %v825_v38 = vadd.f32 %v1680_v48, %v696_v31  ;;  %v739_v27 = vpop.permute.xlu1 %738 }
 0x240   :  { %v832_v34 = vadd.f32 %v799_v39, %v703_v28  ;;  %v830_v35 = vadd.f32 %v794_v41, %v701_v29  ;;  %v828_v37 = vadd.f32 %v1676_v43, %v699_v30  ;;  %v694_v62 = vmul.f32 %v1721_v24, %v1678_v45 }
 0x241   :  { %v863_v56 = vmax.f32 %v831_v32, 0.0  ;;  %v861_v40 = vmax.f32 %v829_v33, 0.0  ;;  %v695_v39 = vmul.f32 %v1726_v51, %v1678_v45  ;;  %v692_v41 = vmul.f32 %v1721_v24, %v1682_v49  ;;  %v1755_v45 = vpop.permute.xlu0 %602 }
 0x242   :  { %v864_v59 = vmax.f32 %v832_v34, 0.0  ;;  %v862_v0 = vmax.f32 %v830_v35, 0.0  ;;  %v826_v1 = vadd.f32 %v1680_v48, %v697_v36  ;;  %v693_v43 = vmul.f32 %v1726_v51, %v1682_v49 }
 0x243   :  { %923 = vmatpush.msrb.mxu2 %v863_v56  ;;  %v859_v2 = vmax.f32 %v827_v57, 0.0  ;;  %v823_v3 = vadd.f32 %v1684_v50, %v694_v62  ;;  %v690_v4 = vmul.f32 %v1721_v24, %v1686_v53  ;;  %v860_v8 = vmax.f32 %v828_v37, 0.0 }
 0x244   :  { %964 = vmatpush.msrb.mxu3 %v864_v59  ;;  %v824_v9 = vadd.f32 %v1684_v50, %v695_v39  ;;  %v691_v12 = vmul.f32 %v1726_v51, %v1686_v53  ;;  %v857_v48 = vmax.f32 %v825_v38, 0.0  ;;  %v821_v49 = vadd.f32 %v1688_v54, %v692_v41 }
 0x245   :  { %924 = vmatpush.msrb.mxu2 %v861_v40  ;;  %v688_v13 = vmul.f32 %v1721_v24, %v1690_v55  ;;  %v858_v14 = vmax.f32 %v826_v1, 0.0  ;;  %v822_v15 = vadd.f32 %v1688_v54, %v693_v43  ;;  %v689_v16 = vmul.f32 %v1726_v51, %v1690_v55 }
 0x246   :  { %965 = vmatpush.msrb.mxu3 %v862_v0  ;;  %v855_v17 = vmax.f32 %v823_v3, 0.0  ;;  %v819_v50 = vadd.f32 %v1692_v60, %v690_v4  ;;  %v686_v53 = vmul.f32 %v1721_v24, %v1694_v61  ;;  %v856_v19 = vmax.f32 %v824_v9, 0.0  ;;  %v598_v32 = vpop.permute.xlu2 %597 }
 0x247   :  { %925 = vmatpush.msrb.mxu2 %v859_v2  ;;  %v820_v20 = vadd.f32 %v1692_v60, %v691_v12  ;;  %v687_v52 = vmul.f32 %v1726_v51, %v1694_v61  ;;  %v853_v26 = vmax.f32 %v821_v49, 0.0  ;;  %v817_v54 = vadd.f32 %v1696_v63, %v688_v13 }
 0x248   :  { %966 = vmatpush.msrb.mxu3 %v860_v8  ;;  %v684_v55 = vmul.f32 %v1721_v24, %v1702_v7  ;;  %v854_v28 = vmax.f32 %v822_v15, 0.0  ;;  %v818_v29 = vadd.f32 %v1696_v63, %v689_v16  ;;  %v685_v30 = vmul.f32 %v1726_v51, %v1702_v7 }
 0x249   :  { %926 = vmatpush.msrb.mxu2 %v857_v48  ;;  %v851_v60 = vmax.f32 %v819_v50, 0.0  ;;  %v815_v31 = vadd.f32 %v1706_v10, %v686_v53  ;;  %v682_v61 = vmul.f32 %v1721_v24, %v1708_v11  ;;  %v852_v33 = vmax.f32 %v820_v20, 0.0  ;;  %v734_v56 = vpop.permute.xlu0 %733 }
 0x24a   :  { %967 = vmatpush.msrb.mxu3 %v858_v14  ;;  %v816_v34 = vadd.f32 %v1706_v10, %v687_v52  ;;  %v683_v35 = vmul.f32 %v1726_v51, %v1708_v11  ;;  %v849_v63 = vmax.f32 %v817_v54, 0.0  ;;  %v813_v36 = vadd.f32 %v1712_v18, %v684_v55 }
 0x24b   :  { %927 = vmatpush.msrb.mxu2 %v855_v17  ;;  %v680_v7 = vmul.f32 %v1721_v24, %v1716_v22  ;;  %v850_v57 = vmax.f32 %v818_v29, 0.0  ;;  %v814_v59 = vadd.f32 %v1712_v18, %v685_v30  ;;  %v681_v37 = vmul.f32 %v1726_v51, %v1716_v22  ;;  %v1197_v29 = vld [vmem:[%s1854_s5 + $0x50] sm:$0xff]  ;;  %v1198_v30 = vld [vmem:[%s1854_s5 + $0x58] sm:$0xff] }
 0x24c   :  { %968 = vmatpush.msrb.mxu3 %v856_v19  ;;  %v847_v10 = vmax.f32 %v815_v31, 0.0  ;;  %v811_v38 = vadd.f32 %v1723_v25, %v682_v61  ;;  %v678_v11 = vmul.f32 %v1721_v24, %v1737_v58  ;;  %v848_v40 = vmax.f32 %v816_v34, 0.0  ;;  %v1200_v31 = vld [vmem:[%s1854_s5 + $0x68] sm:$0xff]  ;;  %v1201_v61 = vld [vmem:[%s1854_s5 + $0x70] sm:$0xff] }
 0x24d   :  { %928 = vmatpush.msrb.mxu2 %v853_v26  ;;  %v812_v62 = vadd.f32 %v1723_v25, %v683_v35  ;;  %v679_v39 = vmul.f32 %v1726_v51, %v1737_v58  ;;  %v845_v41 = vmax.f32 %v813_v36, 0.0  ;;  %v809_v18 = vadd.f32 %v1747_v42, %v680_v7  ;;  %v593_v58 = vpop.permute.xlu1 %592 }
 0x24e   :  { %969 = vmatpush.msrb.mxu3 %v854_v28  ;;  %v676_v22 = vmul.f32 %v1721_v24, %v1755_v45  ;;  %v846_v0 = vmax.f32 %v814_v59, 0.0  ;;  %v810_v1 = vadd.f32 %v1747_v42, %v681_v37  ;;  %v677_v43 = vmul.f32 %v1726_v51, %v1755_v45  ;;  %v729_v42 = vpop.permute.xlu2 %728  ;;  %v1196_v28 = vld [vmem:[%s1854_s5 + $0x48] sm:$0xff] }
 0x24f   :  { %929 = vmatpush.msrb.mxu2 %v851_v60  ;;  %v843_v2 = vmax.f32 %v811_v38, 0.0  ;;  %v807_v25 = vadd.f32 %v739_v27, %v678_v11  ;;  %v674_v3 = vmul.f32 %v1721_v24, %v598_v32  ;;  %v844_v4 = vmax.f32 %v812_v62, 0.0  ;;  %v1199_v60 = vld [vmem:[%s1854_s5 + $0x60] sm:$0xff] }
 0x250   :  { %970 = vmatpush.msrb.mxu3 %v852_v33  ;;  %v808_v8 = vadd.f32 %v739_v27, %v679_v39  ;;  %v675_v9 = vmul.f32 %v1726_v51, %v598_v32  ;;  %v841_v12 = vmax.f32 %v809_v18, 0.0  ;;  %v805_v48 = vadd.f32 %v734_v56, %v676_v22  ;;  %v1202_v32 = vld [vmem:[%s1854_s5 + $0x78] sm:$0xff] }
 0x251   :  { %930 = vmatpush.msrb.mxu2 %v849_v63  ;;  %v672_v49 = vmul.f32 %v1721_v24, %v593_v58  ;;  %v842_v13 = vmax.f32 %v810_v1, 0.0  ;;  %v806_v45 = vadd.f32 %v734_v56, %v677_v43  ;;  %v673_v14 = vmul.f32 %v1726_v51, %v593_v58  ;;  %v724_v17 = vpop.permute.xlu0 %723  ;;  %v1195_v51 = vld [vmem:[%s1854_s5 + $0x40] sm:$0xff] }
 0x252   :  { %971 = vmatpush.msrb.mxu3 %v850_v57  ;;  %v839_v15 = vmax.f32 %v807_v25, 0.0  ;;  %v803_v16 = vadd.f32 %v729_v42, %v674_v3  ;;  %v840_v50 = vmax.f32 %v808_v8, 0.0  ;;  %v804_v53 = vadd.f32 %v729_v42, %v675_v9 }
 0x253   :  { %931 = vmatpush.msrb.mxu2 %v847_v10  ;;  %v837_v19 = vmax.f32 %v805_v48, 0.0  ;;  %v801_v20 = vadd.f32 %v724_v17, %v672_v49  ;;  %v838_v52 = vmax.f32 %v806_v45, 0.0  ;;  %v802_v26 = vadd.f32 %v724_v17, %v673_v14 }
 0x254   :  { %972 = vmatpush.msrb.mxu3 %v848_v40  ;;  %v835_v24 = vmax.f32 %v803_v16, 0.0  ;;  %v836_v54 = vmax.f32 %v804_v53, 0.0 }
 0x255   :  { %932 = vmatpush.msrb.mxu2 %v845_v41  ;;  %v833_v55 = vmax.f32 %v801_v20, 0.0  ;;  %v834_v27 = vmax.f32 %v802_v26, 0.0  ;;  %v921_v11 = vpop.permute.xlu1 %920 }
 0x256   :  { %973 = vmatpush.msrb.mxu3 %v846_v0  ;;  %v916_v40 = vpop.permute.xlu2 %915 }
 0x257   :  { %933 = vmatpush.msrb.mxu2 %v843_v2 }
 0x258   :  { %974 = vmatpush.msrb.mxu3 %v844_v4 }
 0x259   :  { %934 = vmatpush.msrb.mxu2 %v841_v12  ;;  %v911_v41 = vpop.permute.xlu0 %910 }
 0x25a   :  { %975 = vmatpush.msrb.mxu3 %v842_v13 }
 0x25b   :  { %935 = vmatpush.msrb.mxu2 %v839_v15 }
 0x25c   :  { %976 = vmatpush.msrb.mxu3 %v840_v50 }
 0x25d   :  { %936 = vmatpush.msrb.mxu2 %v837_v19  ;;  %v906_v18 = vpop.permute.xlu1 %905 }
 0x25e   :  { %977 = vmatpush.msrb.mxu3 %v838_v52  ;;  %v901_v2 = vpop.permute.xlu2 %900 }
 0x25f   :  { %937 = vmatpush.msrb.mxu2 %v835_v24 }
 0x260   :  { %978 = vmatpush.msrb.mxu3 %v836_v54 }
 0x261   :  { %938 = vmatpush.msrb.mxu2 %v833_v55  ;;  %v896_v14 = vpop.permute.xlu0 %895 }
 0x262   :  { %979 = vmatpush.msrb.mxu3 %v834_v27  ;;  %939 = vmatmul.f32.vlgmr.msrb.gmra.mxu2 %v1195_v51 }
 0x263   :  { %980 = vmatmul.f32.vlgmr.msrb.gmra.mxu3 %v1195_v51 }
 0x265   :  { %v891_v53 = vpop.permute.xlu1 %890 }
 0x266   :  { %v886_v24 = vpop.permute.xlu2 %885 }
 0x26a   :  { %942 = vmatmul.f32.gmra.mxu2 %v1196_v28 }
 0x26b   :  { %983 = vmatmul.f32.gmra.mxu3 %v1196_v28 }
 0x272   :  { %945 = vmatmul.f32.gmra.mxu2 %v1197_v29 }
 0x273   :  { %986 = vmatmul.f32.gmra.mxu3 %v1197_v29 }
 0x27a   :  { %948 = vmatmul.f32.gmra.mxu2 %v1198_v30 }
 0x27b   :  { %989 = vmatmul.f32.gmra.mxu3 %v1198_v30 }
 0x282   :  { %951 = vmatmul.f32.gmra.mxu2 %v1199_v60 }
 0x283   :  { %992 = vmatmul.f32.gmra.mxu3 %v1199_v60 }
 0x28a   :  { %954 = vmatmul.f32.gmra.mxu2 %v1200_v31 }
 0x28b   :  { %995 = vmatmul.f32.gmra.mxu3 %v1200_v31 }
 0x292   :  { %957 = vmatmul.f32.gmra.mxu2 %v1201_v61 }
 0x293   :  { %998 = vmatmul.f32.gmra.mxu3 %v1201_v61  ;;  %v1211_v61 = vld [vmem:[%s1856_s7 + $0x2] sm:$0x3]  ;;  %s1297_s7 = smov [#allocation5]  }
 0x294   :  { %s1150_s22 = sshll.u32 %s1297_s7, 4  ;;  %s1151_s22 = int_to_ptr.vmem [resolvable:$true] %s1150_s22 }
 0x29a   :  { %960 = vmatmul.f32.gmra.mxu2 %v1202_v32 }
 0x29b   :  { %1001 = vmatmul.f32.gmra.mxu3 %v1202_v32 }
 0x2e5   :  { %v940_v33 = vpop.f32.mrf.mxu2 }
 0x2e6   :  { %v981_v34 = vpop.f32.mrf.mxu3  ;;  %v941_v51 = vadd.f32 %v940_v33, %v886_v24  ;;  %v1028_v33 = vpop.permute.xlu0 %1027 }
 0x2e7   :  { %v982_v28 = vadd.f32 %v981_v34, %v886_v24 }
 0x2e8   :  { %v1005_v31 = vmax.f32 %v941_v51, 0.0 }
 0x2e9   :  { %v1006_v32 = vmax.f32 %v982_v28, 0.0 }
 0x2ed   :  { %v943_v35 = vpop.f32.mrf.mxu2 }
 0x2ee   :  { %v984_v63 = vpop.f32.mrf.mxu3  ;;  %v944_v52 = vadd.f32 %v943_v35, %v891_v53 }
 0x2ef   :  { %v985_v54 = vadd.f32 %v984_v63, %v891_v53 }
 0x2f0   :  { %v1007_v30 = vmax.f32 %v944_v52, 0.0 }
 0x2f1   :  { %v1008_v60 = vmax.f32 %v985_v54, 0.0 }
 0x2f5   :  { %v946_v36 = vpop.f32.mrf.mxu2 }
 0x2f6   :  { %v987_v7 = vpop.f32.mrf.mxu3  ;;  %v947_v17 = vadd.f32 %v946_v36, %v896_v14 }
 0x2f7   :  { %v988_v19 = vadd.f32 %v987_v7, %v896_v14  ;;  %v1076_v7 = vstv %s1215_s1 }
 0x2f8   :  { %v1009_v27 = vmax.f32 %v947_v17, 0.0 }
 0x2f9   :  { %v1010_v29 = vmax.f32 %v988_v19, 0.0 }
 0x2fd   :  { %v949_v56 = vpop.f32.mrf.mxu2 }
 0x2fe   :  { %v990_v57 = vpop.f32.mrf.mxu3  ;;  %v950_v13 = vadd.f32 %v949_v56, %v901_v2 }
 0x2ff   :  { %v991_v15 = vadd.f32 %v990_v57, %v901_v2  ;;  %v1080_v57 = vstv %s1216_s8 }
 0x300   :  { %v1011_v26 = vmax.f32 %v950_v13, 0.0 }
 0x301   :  { %v1012_v55 = vmax.f32 %v991_v15, 0.0 }
 0x305   :  { %v952_v59 = vpop.f32.mrf.mxu2 }
 0x306   :  { %v993_v37 = vpop.f32.mrf.mxu3  ;;  %v953_v12 = vadd.f32 %v952_v59, %v906_v18 }
 0x307   :  { %v994_v49 = vadd.f32 %v993_v37, %v906_v18 }
 0x308   :  { %v1013_v50 = vmax.f32 %v953_v12, 0.0 }
 0x309   :  { %v1014_v20 = vmax.f32 %v994_v49, 0.0  ;;  %v1114_v49 = vrot.slane %v1718_v23, 7 }
 0x30d   :  { %v955_v10 = vpop.f32.mrf.mxu2 }
 0x30e   :  { %v996_v38 = vpop.f32.mrf.mxu3  ;;  %v956_v58 = vadd.f32 %v955_v10, %v911_v41 }
 0x30f   :  { %v997_v8 = vadd.f32 %v996_v38, %v911_v41 }
 0x310   :  { %v1015_v45 = vmax.f32 %v956_v58, 0.0  ;;  %v1102_v58 = vmul.f32 %v1718_v23, %v1718_v23 }
 0x311   :  { %v1016_v16 = vmax.f32 %v997_v8, 0.0 }
 0x315   :  { %v958_v62 = vpop.f32.mrf.mxu2 }
 0x316   :  { %v999_v39 = vpop.f32.mrf.mxu3  ;;  %v959_v0 = vadd.f32 %v958_v62, %v916_v40 }
 0x317   :  { %v1000_v25 = vadd.f32 %v999_v39, %v916_v40 }
 0x318   :  { %v1017_v48 = vmax.f32 %v959_v0, 0.0 }
 0x319   :  { %v1018_v42 = vmax.f32 %v1000_v25, 0.0  ;;  %v1101_v25 = vmul.f32 %v1714_v21, %v1714_v21 }
 0x31d   :  { %v961_v22 = vpop.f32.mrf.mxu2 }
 0x31e   :  { %v962_v1 = vadd.f32 %v961_v22, %v921_v11  ;;  %v1002_v43 = vpop.f32.mrf.mxu3 }
 0x31f   :  { %v1003_v3 = vadd.f32 %v1002_v43, %v921_v11 }
 0x320   :  { %v1019_v4 = vmax.f32 %v962_v1, 0.0 }
 0x321   :  { %v1020_v9 = vmax.f32 %v1003_v3, 0.0 }
 0x322   :  { %1041 = vmatpush.msrb.mxu0 %v1019_v4 }
 0x323   :  { %1061 = vmatpush.msrb.mxu1 %v1020_v9 }
 0x324   :  { %1042 = vmatpush.msrb.mxu0 %v1017_v48 }
 0x325   :  { %1062 = vmatpush.msrb.mxu1 %v1018_v42 }
 0x326   :  { %1043 = vmatpush.msrb.mxu0 %v1015_v45  ;;  %v1113_v45 = vrot.slane %v1714_v21, 7 }
 0x327   :  { %1063 = vmatpush.msrb.mxu1 %v1016_v16 }
 0x328   :  { %1044 = vmatpush.msrb.mxu0 %v1013_v50 }
 0x329   :  { %1064 = vmatpush.msrb.mxu1 %v1014_v20 }
 0x32a   :  { %1045 = vmatpush.msrb.mxu0 %v1011_v26 }
 0x32b   :  { %1065 = vmatpush.msrb.mxu1 %v1012_v55 }
 0x32c   :  { %1046 = vmatpush.msrb.mxu0 %v1009_v27 }
 0x32d   :  { %1066 = vmatpush.msrb.mxu1 %v1010_v29 }
 0x32e   :  { %1047 = vmatpush.msrb.mxu0 %v1007_v30 }
 0x32f   :  { %1067 = vmatpush.msrb.mxu1 %v1008_v60 }
 0x330   :  { %1048 = vmatpush.msrb.mxu0 %v1005_v31 }
 0x331   :  { %1068 = vmatpush.msrb.mxu1 %v1006_v32  ;;  %1213 = vmatmul.msk.f32.vlgmr.msrb.gmra.mxu0 %vm499_vm0, %v1211_v61 }
 0x332   :  { %1214 = vmatmul.msk.f32.vlgmr.msrb.gmra.mxu1 %vm499_vm0, %v1211_v61 }
 0x3ae   :  { %v1050_v34 = vpop.f32.mrf.mxu0 }
 0x3af   :  { %v1051_v35 = vadd.f32 %v1050_v34, %v1028_v33  ;;  %v1070_v63 = vpop.f32.mrf.mxu1 }
 0x3b0   :  { %v1071_v36 = vadd.f32 %v1070_v63, %v1028_v33 }
 0x3b1   :  { %1234 = vtanh.f32 %v1051_v35  ;;  %v1091_v22 = vrot.slane %v1051_v35, 1 }
 0x3b2   :  { %1236 = vtanh.f32 %v1071_v36  ;;  %v1092_v1 = vrot.slane %v1071_v36, 1 }
 0x3b7   :  { %v1235_v56 = vpop.eup %1234 }
 0x3b8   :  { %v1237_v59 = vpop.eup %1236  ;;  %v1077_v37 = vmul.f32 %v1235_v56, %v1076_v7 }
 0x3b9   :  { %v1078_v10 = vmul.f32 %v1237_v59, %v1076_v7 }
 0x3ba   :  { %v1081_v38 = vadd.f32 %v1080_v57, %v1077_v37 }
 0x3bb   :  { %v1082_v11 = vadd.f32 %v1080_v57, %v1078_v10 }
 0x3bc   :  { %v1083_v40 = vmul.f32 1.442695, %v1081_v38 }
 0x3bd   :  { %v1085_v62 = vmul.f32 1.442695, %v1082_v11  ;;  %v1098_v44 = vadd.f32 %v1082_v11, %v1700_v6 }
 0x3be   :  { %1238 = vpow2.f32 %v1083_v40 }
 0x3bf   :  { %1240 = vpow2.f32 %v1085_v62  ;;  %v1120_v16 = vrot.slane %v1098_v44, 6 }
 0x3c4   :  { %v1239_v39 = vpop.eup %1238 }
 0x3c5   :  { %v1241_v41 = vpop.eup %1240  ;;  %v1087_v18 = vmul.f32 %v1239_v39, %v140_v46 }
 0x3c6   :  { %v1088_v0 = vmul.f32 %v1241_v41, %v141_v47  ;;  %v1097_v47 = vadd.f32 %v1081_v38, %v1698_v5 }
 0x3c7   :  { %v1095_v43 = vadd.f32 %v1091_v22, %v1087_v18 }
 0x3c8   :  { %v1096_v2 = vadd.f32 %v1092_v1, %v1088_v0  ;;  %v1119_v19 = vrot.slane %v1097_v47, 6 }
 0x3c9   :  { %v1099_v3 = vmul.f32 %v1095_v43, %v1095_v43  ;;  %v1130_v17 = vsel %vm1129_vm1, %v1095_v43, %v1113_v45 }
 0x3ca   :  { %v1100_v4 = vmul.f32 %v1096_v2, %v1096_v2  ;;  %v1131_v15 = vsel %vm1129_vm1, %v1096_v2, %v1114_v49  ;;  %v1133_v6 = vsel %vm1132_vm2, %v1130_v17, %v1119_v19 }
 0x3cb   :  { %v1103_v8 = vadd.f32 %v1101_v25, %v1099_v3  ;;  %v1134_v20 = vsel %vm1132_vm2, %v1131_v15, %v1120_v16 }
 0x3cc   :  { %v1104_v9 = vadd.f32 %v1102_v58, %v1100_v4 }
 0x3cd   :  { %v1105_v12 = vmul.f32 -0.5, %v1103_v8 }
 0x3ce   :  { %v1106_v48 = vmul.f32 -0.5, %v1104_v9 }
 0x3cf   :  { %v1217_v46 = vadd.f32 -1.837877, %v1105_v12 }
 0x3d0   :  { %v1218_v42 = vadd.f32 -1.837877, %v1106_v48 }
 0x3d1   :  { %v1109_v13 = vadd.f32 %v1217_v46, %v1097_v47 }
 0x3d2   :  { %v1110_v14 = vadd.f32 %v1218_v42, %v1098_v44 }
 0x3d3   :  { %v1125_v53 = vrot.slane %v1109_v13, 5 }
 0x3d4   :  { %v1126_v50 = vrot.slane %v1110_v14, 5 }
 0x3d5   :  { %v1136_v23 = vsel %vm1135_vm3, %v1133_v6, %v1125_v53 }
 0x3d6   :  { %v1137_v5 = vsel %vm1135_vm3, %v1134_v20, %v1126_v50 }
 0x3d7   :  { %v1140_v21 = vrot.slane %v1137_v5, 4 }
 0x3d9   :  { %v1142_v52 = vsel %vm1141_vm4, %v1136_v23, %v1140_v21 }
 0x3da   :  { %1144 = vst [vmem:[#allocation5] sm:$0xff] %v1142_v52 }
 0x3db   :  { %1155 = dma.vmem_to_hbm [thread:$0]  %s1151_s22, 128, %s1153_s4, [#allocation6]  }
 0x3dc   :  { %1292 = dma.done.wait [#allocation6], 128  }
 0x3dd   :  { %1293 = vsyncadd [#allocation6], 4294967168 }
 0x3de   :  { %1160 = vsyncpa [#allocation6], 1 }

</bundles_post_ra>
